<compile_context>
chip_gen: v5e
topology: v5e:2x2
jax: 0.10.0
libtpu: 0.0.40
codegen_flags: <defaults>
</compile_context>

<pallas_src>
import functools
import math

import jax
import jax.numpy as jnp
from jax import lax
from jax.experimental import pallas as pl
from jax.experimental.pallas import tpu as pltpu

TILE_N = 1024                      # pixels per tile on the 128-lane axis
MATMUL_DTYPE = jnp.bfloat16        # MXU operand dtype; accumulation stays f32
ACT_DTYPE = jnp.bfloat16           # intermediate activation storage dtype
VMEM_LIMIT = 48 * 1024 * 1024      # < v7x's 64 MiB physical VMEM, plenty on v5e/v6e
_MIN_PALLAS_PIXELS = 128           # below this, fall back to plain XLA


# ----------------------------------------------------------------------------
# Fused epilogues (shared by the Pallas kernels and the tiny-layer XLA fallback)
# ----------------------------------------------------------------------------
def _act_epilogue(acc, act):
    if act == "leaky_relu":
        return jnp.where(acc >= 0.0, acc, 0.01 * acc)      # nn.LeakyReLU default slope
    return acc


def _gdn_epilogue(acc, gamma, beta, inverse, groups):
    """(Inverse-)GDN on a channel-major (groups*C, tile) block.

    norm = gamma @ x^2 + beta, evaluated independently per `groups` sub-block (the
    fused sub-pixel deconv stacks 4 independent phase outputs along channels).
    gamma and x^2 are bf16 so the norm matmul is a single MXU pass (f32 accumulate).
    """
    C = gamma.shape[0]
    out = []
    for s in range(groups):
        blk = acc[s * C:(s + 1) * C]
        norm = jnp.dot(gamma, (blk * blk).astype(gamma.dtype),
                       preferred_element_type=jnp.float32) + beta
        out.append(blk * (jnp.sqrt(norm) if inverse else lax.rsqrt(norm)))
    return out[0] if groups == 1 else jnp.concatenate(out, axis=0)


# ----------------------------------------------------------------------------
# Pallas kernels: (Ctot, K) @ (K, tile_n) + bias, fused epilogues, bf16 outputs
# ----------------------------------------------------------------------------
def _mm_act_kernel(a_ref, w_ref, b_ref, o_ref, *, act):
    acc = jnp.dot(w_ref[...], a_ref[...], preferred_element_type=jnp.float32)
    acc = acc + b_ref[...]
    o_ref[...] = _act_epilogue(acc, act).astype(o_ref.dtype)


def _mm_gdn_kernel(a_ref, w_ref, b_ref, g_ref, beta_ref, o_ref, *, inverse, groups):
    acc = jnp.dot(w_ref[...], a_ref[...], preferred_element_type=jnp.float32)
    acc = acc + b_ref[...]
    acc = _gdn_epilogue(acc, g_ref[...], beta_ref[...], inverse, groups)
    o_ref[...] = acc.astype(o_ref.dtype)


def fused_matmul(a, w, b, *, act=None, gdn=None, groups=1,
                 out_dtype=ACT_DTYPE, tile_n=TILE_N):
    """out = w @ a + b with a fused LeakyReLU / (I)GDN epilogue.

    a: (K, P) bf16 patch matrix (pixels on the lane axis), w: (Ctot, K) bf16,
    b: (Ctot, 1) f32.  gdn: None or (gamma bf16 (C,C), beta f32 (C,1), inverse).
    """
    K, P = a.shape
    Ct = w.shape[0]

    if P < _MIN_PALLAS_PIXELS or P % 128 != 0:
        # Tiny / lane-ragged pixel counts (deep h_a / h_s stages): a one-tile Pallas
        # launch is pure overhead and forces masked partial stores -> plain XLA,
        # with identical math (bf16 operands, f32 accumulation, same epilogue).
        acc = jnp.dot(w, a, preferred_element_type=jnp.float32) + b
        if gdn is not None:
            acc = _gdn_epilogue(acc, *gdn, groups)
        else:
            acc = _act_epilogue(acc, act)
        return acc.astype(out_dtype)

    tn = tile_n if P % tile_n == 0 else min(tile_n, P)
    grid = (pl.cdiv(P, tn),)
    cparams = pltpu.CompilerParams(
        dimension_semantics=("parallel",),     # megacore / v7x 2-TC sharding
        vmem_limit_bytes=VMEM_LIMIT,
    )
    const = lambda i: (0, 0)                   # grid-invariant operands, fetched once

    if gdn is None:
        kernel = functools.partial(_mm_act_kernel, act=act)
        in_specs = [pl.BlockSpec((K, tn), lambda i: (0, i)),
                    pl.BlockSpec((Ct, K), const),
                    pl.BlockSpec((Ct, 1), const)]
        operands = (a, w, b)
    else:
        gamma, beta, inverse = gdn
        C = gamma.shape[0]
        kernel = functools.partial(_mm_gdn_kernel, inverse=inverse, groups=groups)
        in_specs = [pl.BlockSpec((K, tn), lambda i: (0, i)),
                    pl.BlockSpec((Ct, K), const),
                    pl.BlockSpec((Ct, 1), const),
                    pl.BlockSpec((C, C), const),
                    pl.BlockSpec((C, 1), const)]
        operands = (a, w, b, gamma, beta)

    return pl.pallas_call(
        kernel,
        out_shape=jax.ShapeDtypeStruct((Ct, P), out_dtype),
        grid=grid,
        in_specs=in_specs,
        out_specs=pl.BlockSpec((Ct, tn), lambda i: (0, i)),
        compiler_params=cparams,
    )(*operands)


# ----------------------------------------------------------------------------
# Conv / fused sub-pixel deconv wrappers (channel-major (C, B, H, W) throughout)
# ----------------------------------------------------------------------------
def _im2col_cm(x, k, stride, pad):
    """x: (C, B, H, W) bf16 -> patches (C*k*k, B*Ho*Wo), K ordered (ci, di, dj).
    TODO(synk): still an XLA-side materialization (see header)."""
    C, B, H, W = x.shape
    xp = jnp.pad(x, ((0, 0), (0, 0), (pad, pad), (pad, pad)))
    Hp, Wp = H + 2 * pad, W + 2 * pad
    Ho = (Hp - k) // stride + 1
    Wo = (Wp - k) // stride + 1
    taps = []
    for di in range(k):
        for dj in range(k):
            taps.append(xp[:, :, di:di + stride * Ho:stride, dj:dj + stride * Wo:stride])
    A = jnp.stack(taps, axis=1).reshape(C * k * k, B * Ho * Wo)
    return A, (B, Ho, Wo)


def _gdn_arg(gdn):
    if gdn is None:
        return None
    gp, inverse = gdn
    return (gp["gamma"], gp["beta"], inverse)


def conv_op(x_cm, prep, *, k, stride, pad, act=None, gdn=None, out_dtype=ACT_DTYPE):
    """nn.Conv2d (+fused epilogue). x_cm: (Cin, B, H, W); prep from prepare_params."""
    A, (B, Ho, Wo) = _im2col_cm(x_cm.astype(MATMUL_DTYPE), k, stride, pad)
    cout = prep["b"].shape[0]
    out = fused_matmul(A, prep["w"], prep["b"], act=act, gdn=_gdn_arg(gdn),
                       groups=1, out_dtype=out_dtype)
    return out.reshape(cout, B, Ho, Wo)


def deconv_op(x_cm, prep, *, act=None, gdn=None, out_dtype=ACT_DTYPE):
    """nn.ConvTranspose2d(k=5, s=2, p=2, output_padding=1) as ONE fused Pallas call.

    All four sub-pixel phases share one (Cin*9, P_in) patch matrix and one stacked
    (4*Cout, Cin*9) weight matrix (zero taps where a phase does not use a window
    position); the epilogue is applied per phase (groups=4).  The interleave is a
    bf16 transpose followed by a free row-major reshape.
    """
    Cin, B, H, W = x_cm.shape
    A, _ = _im2col_cm(x_cm.astype(MATMUL_DTYPE), 3, 1, 1)
    cout = prep["b"].shape[0] // 4
    out = fused_matmul(A, prep["w"], prep["b"], act=act, gdn=_gdn_arg(gdn),
                       groups=4, out_dtype=out_dtype)
    out = out.reshape(2, 2, cout, B, H, W)            # (rh, rw, C, B, H, W)
    out = jnp.transpose(out, (2, 3, 4, 0, 5, 1))      # (C, B, H, rh, W, rw)
    return out.reshape(cout, B, 2 * H, 2 * W)         # free reshape = pixel shuffle


# ----------------------------------------------------------------------------
# Entropy models (elementwise / tiny per-channel MLP — plain JAX glue)
# ----------------------------------------------------------------------------
def _eb_logits_cumulative(eb, inputs):
    logits = inputs                                    # (C, 1, Npix)
    n = len(eb["matrices"])
    for i in range(n):
        m = jax.nn.softplus(eb["matrices"][i])         # (C, dout, din)
        logits = jnp.einsum("cod,cdn->con", m, logits) + eb["biases"][i]
        if i < n - 1:
            logits = logits + jnp.tanh(eb["factors"][i]) * jnp.tanh(logits)
    return logits


def entropy_bottleneck_forward(eb, z_cm):
    # Eval-mode quantization (round w/ medians).
    # TODO(synk): training-mode additive-uniform-noise quantization not reproduced.
    C, B, H, W = z_cm.shape
    medians = eb["quantiles"][:, :, 1:2]               # (C, 1, 1)
    values = z_cm.reshape(C, 1, -1)
    outputs = jnp.round(values - medians) + medians
    lower = _eb_logits_cumulative(eb, outputs - 0.5)
    upper = _eb_logits_cumulative(eb, outputs + 0.5)
    sign = -jnp.sign(lower + upper)
    likelihood = jnp.abs(jax.nn.sigmoid(sign * upper) - jax.nn.sigmoid(sign * lower))
    likelihood = jnp.maximum(likelihood, 1e-9)
    return outputs.reshape(C, B, H, W), likelihood.reshape(C, B, H, W)


def gaussian_conditional_forward(y, scales, means, scale_bound=0.11, lik_bound=1e-9):
    y_hat = jnp.round(y - means) + means               # eval-mode "dequantize"
    s = jnp.maximum(scales, scale_bound)
    values = jnp.abs(y_hat - means)
    c = 1.0 / math.sqrt(2.0)
    upper = 0.5 * jax.scipy.special.erfc(-(0.5 - values) / s * c)
    lower = 0.5 * jax.scipy.special.erfc(-(-0.5 - values) / s * c)
    lik = jnp.maximum(upper - lower, lik_bound)
    return y_hat, lik


# ----------------------------------------------------------------------------
# Parameter init (deterministic, synthetic — matches the PyTorch module shapes)
# ----------------------------------------------------------------------------
def _init_conv(key, cin, cout, k):
    kw, kb = jax.random.split(key)
    w = jax.random.normal(kw, (cout, cin, k, k), jnp.float32) / math.sqrt(cin * k * k)
    b = 0.01 * jax.random.normal(kb, (cout,), jnp.float32)
    return w, b


def _init_deconv(key, cin, cout, k):
    kw, kb = jax.random.split(key)
    w = jax.random.normal(kw, (cin, cout, k, k), jnp.float32) / math.sqrt(cin * k * k)
    b = 0.01 * jax.random.normal(kb, (cout,), jnp.float32)
    return w, b


def _init_gdn(key, ch):
    gamma = 0.1 * jnp.eye(ch, dtype=jnp.float32) + 1e-3 * jnp.abs(
        jax.random.normal(key, (ch, ch), jnp.float32))
    beta = jnp.ones((ch,), jnp.float32)
    return gamma, beta


def _init_entropy_bottleneck(key, channels, filters=(3, 3, 3, 3), init_scale=10.0):
    dims = (1,) + tuple(filters) + (1,)
    scale = init_scale ** (1.0 / (len(filters) + 1))
    keys = jax.random.split(key, len(filters) + 1)
    matrices, biases, factors = [], [], []
    for i in range(len(filters) + 1):
        init_m = math.log(math.expm1(1.0 / scale / dims[i + 1]))
        matrices.append(jnp.full((channels, dims[i + 1], dims[i]), init_m, jnp.float32))
        biases.append(jax.random.uniform(keys[i], (channels, dims[i + 1], 1),
                                         jnp.float32, -0.5, 0.5))
        if i < len(filters):
            factors.append(jnp.zeros((channels, dims[i + 1], 1), jnp.float32))
    quantiles = jnp.tile(jnp.array([[-init_scale, 0.0, init_scale]], jnp.float32),
                         (channels, 1, 1))
    return {"matrices": matrices, "biases": biases, "factors": factors,
            "quantiles": quantiles}


def init_params(key, in_ch=3, N=8, M=8, out_ch=3):
    keys = list(jax.random.split(key, 24))
    nxt = iter(keys)
    return {
        "g_a": [_init_conv(next(nxt), in_ch, N, 5),
                _init_conv(next(nxt), N, N, 5),
                _init_conv(next(nxt), N, N, 5),
                _init_conv(next(nxt), N, M, 5)],
        "g_a_gdn": [_init_gdn(next(nxt), N) for _ in range(3)],
        "g_s": [_init_deconv(next(nxt), M, N, 5),
                _init_deconv(next(nxt), N, N, 5),
                _init_deconv(next(nxt), N, N, 5),
                _init_deconv(next(nxt), N, out_ch, 5)],
        "g_s_gdn": [_init_gdn(next(nxt), N) for _ in range(3)],
        "h_a": [_init_conv(next(nxt), M, N, 3),
                _init_conv(next(nxt), N, N, 5),
                _init_conv(next(nxt), N, N, 5)],
        "h_s": [_init_deconv(next(nxt), N, M, 5),
                _init_deconv(next(nxt), M, M * 3 // 2, 5),
                _init_conv(next(nxt), M * 3 // 2, M * 2, 3)],
        "eb": _init_entropy_bottleneck(next(nxt), M),
    }


# ----------------------------------------------------------------------------
# One-time parameter preparation (hoisted out of the forward pass)
# ----------------------------------------------------------------------------
# ConvTranspose2d(k=5,s=2,p=2,op=1) sub-pixel decomposition, derived from
#   out[2m+rh] = sum_t w[ky] * x[m-1+u]   with (u, ky) mappings:
#     even rows (rh=0): u=0,1,2 -> ky=4,2,0     (window offset 0)
#     odd  rows (rh=1): u=1,2   -> ky=3,1       (window offset 1; u=0 tap is zero)
# (same along width).  All four phases therefore fit in a shared 3x3 input window
# (stride 1, pad 1), i.e. one Cin*9-deep patch matrix.  Validated in __main__.
_DECONV_TAPS = ((4, 2, 0), (3, 1))
_DECONV_OFFS = (0, 1)


def _prep_conv(wb):
    w, b = wb                                          # (Cout, Cin, kh, kw)
    cout = w.shape[0]
    return {"w": w.reshape(cout, -1).astype(MATMUL_DTYPE),
            "b": b.reshape(cout, 1).astype(jnp.float32)}


def _prep_gdn(gb):
    gamma, beta = gb
    return {"gamma": gamma.astype(MATMUL_DTYPE),
            "beta": beta.reshape(-1, 1).astype(jnp.float32)}


def _prep_deconv(wb):
    w, b = wb                                          # (Cin, Cout, 5, 5)
    cin, cout = w.shape[0], w.shape[1]
    blocks = []
    for rh in range(2):
        for rw in range(2):
            tr = jnp.asarray(_DECONV_TAPS[rh])
            tc = jnp.asarray(_DECONV_TAPS[rw])
            sub = w[:, :, tr[:, None], tc[None, :]]    # (Cin, Cout, lr, lc)
            sub = jnp.transpose(sub, (1, 0, 2, 3))     # (Cout, Cin, lr, lc)
            blk = jnp.zeros((cout, cin, 3, 3), w.dtype)
            blk = blk.at[:, :,
                         _DECONV_OFFS[rh]:_DECONV_OFFS[rh] + len(_DECONV_TAPS[rh]),
                         _DECONV_OFFS[rw]:_DECONV_OFFS[rw] + len(_DECONV_TAPS[rw])].set(sub)
            blocks.append(blk)
    w_fused = jnp.stack(blocks, axis=0).reshape(4 * cout, cin * 9).astype(MATMUL_DTYPE)
    b_fused = jnp.tile(b.reshape(1, cout, 1), (4, 1, 1)).reshape(4 * cout, 1)
    return {"w": w_fused, "b": b_fused.astype(jnp.float32)}


def prepare_params(params):
    """Convert PyTorch-layout params into matmul-ready bf16 weight matrices (once)."""
    return {
        "g_a": [_prep_conv(wb) for wb in params["g_a"]],
        "g_a_gdn": [_prep_gdn(gb) for gb in params["g_a_gdn"]],
        "g_s": [_prep_deconv(wb) for wb in params["g_s"]],
        "g_s_gdn": [_prep_gdn(gb) for gb in params["g_s_gdn"]],
        "h_a": [_prep_conv(wb) for wb in params["h_a"]],
        "h_s": [_prep_deconv(params["h_s"][0]), _prep_deconv(params["h_s"][1]),
                _prep_conv(params["h_s"][2])],
        "eb": params["eb"],
    }


# ----------------------------------------------------------------------------
# Full forward pass (activations are channel-major (C, B, H, W), bf16 throughout;
# f32 only where the entropy models need it)
# ----------------------------------------------------------------------------
def mean_scale_hyperprior_forward(p, x):
    xcm = jnp.transpose(x, (1, 0, 2, 3)).astype(MATMUL_DTYPE)   # NCHW -> channel-major

    # g_a: conv with fused GDN x3 + final conv
    h = conv_op(xcm, p["g_a"][0], k=5, stride=2, pad=2, gdn=(p["g_a_gdn"][0], False))
    h = conv_op(h,   p["g_a"][1], k=5, stride=2, pad=2, gdn=(p["g_a_gdn"][1], False))
    h = conv_op(h,   p["g_a"][2], k=5, stride=2, pad=2, gdn=(p["g_a_gdn"][2], False))
    y = conv_op(h,   p["g_a"][3], k=5, stride=2, pad=2, out_dtype=jnp.float32)

    # h_a (LeakyReLU fused)
    t = conv_op(y, p["h_a"][0], k=3, stride=1, pad=1, act="leaky_relu")
    t = conv_op(t, p["h_a"][1], k=5, stride=2, pad=2, act="leaky_relu")
    z = conv_op(t, p["h_a"][2], k=5, stride=2, pad=2, out_dtype=jnp.float32)

    # entropy bottleneck
    z_hat, z_lik_cm = entropy_bottleneck_forward(p["eb"], z)

    # h_s (fused sub-pixel deconvs, LeakyReLU fused)
    u = deconv_op(z_hat, p["h_s"][0], act="leaky_relu")
    u = deconv_op(u,     p["h_s"][1], act="leaky_relu")
    gp = conv_op(u, p["h_s"][2], k=3, stride=1, pad=1, out_dtype=jnp.float32)
    Mch = gp.shape[0] // 2
    scales_hat, means_hat = gp[:Mch], gp[Mch:]                  # .chunk(2, 1) in NCHW

    # gaussian conditional
    y_hat, y_lik_cm = gaussian_conditional_forward(y, scales_hat, means_hat)

    # g_s: fused sub-pixel deconv with IGDN x3 + final deconv
    v = deconv_op(y_hat, p["g_s"][0], gdn=(p["g_s_gdn"][0], True))
    v = deconv_op(v,     p["g_s"][1], gdn=(p["g_s_gdn"][1], True))
    v = deconv_op(v,     p["g_s"][2], gdn=(p["g_s_gdn"][2], True))
    x_hat_cm = deconv_op(v, p["g_s"][3], out_dtype=jnp.float32)

    # boundary conversion back to NCHW
    x_hat = jnp.transpose(x_hat_cm, (1, 0, 2, 3))
    y_lik = jnp.transpose(y_lik_cm, (1, 0, 2, 3))
    z_lik = jnp.transpose(z_lik_cm, (1, 0, 2, 3))
    return {"x_hat": x_hat, "likelihoods": {"y": y_lik, "z": z_lik}}


# ----------------------------------------------------------------------------
# Plain-JAX references (used only to validate the Pallas conv / deconv in __main__)
# ----------------------------------------------------------------------------
def _ref_conv_nchw(x, w, b, stride, pad):
    out = lax.conv_general_dilated(x, w, (stride, stride), [(pad, pad), (pad, pad)],
                                   dimension_numbers=("NCHW", "OIHW", "NCHW"))
    return out + b.reshape(1, -1, 1, 1)


def _ref_deconv_nchw(x, w, b):
    # PyTorch ConvTranspose2d(k=5, s=2, p=2, output_padding=1), w: (Cin, Cout, 5, 5)
    w_eq = jnp.flip(w, (2, 3)).transpose(1, 0, 2, 3)            # (Cout, Cin, 5, 5)
    out = lax.conv_general_dilated(x, w_eq, (1, 1), [(2, 3), (2, 3)],
                                   lhs_dilation=(2, 2),
                                   dimension_numbers=("NCHW", "OIHW", "NCHW"))
    return out + b.reshape(1, -1, 1, 1)


def _ref_gdn(x, gamma, beta, inverse):
    norm = jnp.einsum("ij,bjhw->bihw", gamma, x * x) + beta.reshape(1, -1, 1, 1)
    return x * (jnp.sqrt(norm) if inverse else lax.rsqrt(norm))


def _assert_close(name, got, ref, tol=0.05):
    got = got.astype(jnp.float32)
    err = float(jnp.max(jnp.abs(got - ref)))
    bound = tol * (float(jnp.max(jnp.abs(ref))) + 1.0)
    assert err <= bound, f"{name}: max|err|={err:.4f} > bound={bound:.4f}"


# ----------------------------------------------------------------------------
if __name__ == "__main__":
    key = jax.random.PRNGKey(0)
    pkey, xkey, vkey = jax.random.split(key, 3)

    # ---- numerical validation of the Pallas conv & fused sub-pixel deconv ----
    vk = jax.random.split(vkey, 6)
    Cin = Cout = 8
    wc, bc = _init_conv(vk[0], Cin, Cout, 5)
    gg, gb = _init_gdn(vk[1], Cout)
    xc = jax.random.normal(vk[2], (2, Cin, 16, 16), jnp.float32)
    got = conv_op(jnp.transpose(xc, (1, 0, 2, 3)), _prep_conv((wc, bc)),
                  k=5, stride=2, pad=2, gdn=(_prep_gdn((gg, gb)), False),
                  out_dtype=jnp.float32)
    ref = _ref_gdn(_ref_conv_nchw(xc, wc, bc, 2, 2), gg, gb, False)
    _assert_close("conv+GDN", jnp.transpose(got, (1, 0, 2, 3)), ref)

    wd, bd = _init_deconv(vk[3], Cin, Cout, 5)
    gg2, gb2 = _init_gdn(vk[4], Cout)
    xd = jax.random.normal(vk[5], (2, Cin, 8, 8), jnp.float32)
    got = deconv_op(jnp.transpose(xd, (1, 0, 2, 3)), _prep_deconv((wd, bd)),
                    gdn=(_prep_gdn((gg2, gb2)), True), out_dtype=jnp.float32)
    ref = _ref_gdn(_ref_deconv_nchw(xd, wd, bd), gg2, gb2, True)
    _assert_close("deconv+IGDN", jnp.transpose(got, (1, 0, 2, 3)), ref)

    # ---- full model (toy config: N=M=8, input 2x3x64x64) ----
    # NOTE: at this toy size (Cout=8 -> ~3% MXU utilization) the model is launch /
    # DMA-overhead bound; realistic configs are N=M=128 at >=256x256 images.
    N = M = 8
    params = init_params(pkey, in_ch=3, N=N, M=M, out_ch=3)
    prepped = prepare_params(params)
    x = jax.random.uniform(xkey, (2, 3, 64, 64), jnp.float32)

    fwd = jax.jit(mean_scale_hyperprior_forward)
    out = jax.block_until_ready(fwd(prepped, x))

    assert out["x_hat"].shape == (2, 3, 64, 64)
    assert out["likelihoods"]["y"].shape == (2, M, 4, 4)
    assert out["likelihoods"]["z"].shape == (2, M, 1, 1)
    assert bool(jnp.all(jnp.isfinite(out["x_hat"])))
    assert bool(jnp.all(out["likelihoods"]["y"] > 0))
    assert bool(jnp.all(out["likelihoods"]["z"] > 0))
    print("KERNEL_OK")
</pallas_src>

<mosaic_0001>
module attributes {stable_mosaic.version = 11 : i64} {
  func.func @_mm_gdn_kernel(%arg0: i32, %arg1: memref<200x128xbf16, #tpu.memory_space<vmem>>, %arg2: memref<8x200xbf16, #tpu.memory_space<vmem>>, %arg3: memref<8x1xf32, #tpu.memory_space<vmem>>, %arg4: memref<8x8xbf16, #tpu.memory_space<vmem>>, %arg5: memref<8x1xf32, #tpu.memory_space<vmem>>, %arg6: memref<8x128xf32, #tpu.memory_space<vmem>>) attributes {dimension_semantics = [#tpu.dimension_semantics<parallel>], iteration_bounds = array<i64: 1>, scalar_prefetch = 0 : i64, scratch_operands = 0 : i64, tpu.core_type = #tpu.core_type<tc>, window_params = [{transform_indices = @transform_0, window_bounds = array<i64: 200, 128>}, {pipeline_mode = #tpu.pipeline_mode<synchronous>, transform_indices = @transform_1, window_bounds = array<i64: 8, 200>}, {pipeline_mode = #tpu.pipeline_mode<synchronous>, transform_indices = @transform_2, window_bounds = array<i64: 8, 1>}, {pipeline_mode = #tpu.pipeline_mode<synchronous>, transform_indices = @transform_3, window_bounds = array<i64: 8, 8>}, {pipeline_mode = #tpu.pipeline_mode<synchronous>, transform_indices = @transform_4, window_bounds = array<i64: 8, 1>}, {transform_indices = @transform_5, window_bounds = array<i64: 8, 128>}]} {
    %c0 = arith.constant 0 : index
    %c0_0 = arith.constant 0 : index
    %0 = vector.load %arg2[%c0, %c0_0] : memref<8x200xbf16, #tpu.memory_space<vmem>>, vector<8x200xbf16>
    %c0_1 = arith.constant 0 : index
    %c0_2 = arith.constant 0 : index
    %1 = vector.load %arg1[%c0_1, %c0_2] : memref<200x128xbf16, #tpu.memory_space<vmem>>, vector<200x128xbf16>
    %cst = arith.constant dense<0.000000e+00> : vector<8x128xf32>
    %2 = tpu.matmul %0, %1, %cst {dimension_numbers = #tpu.dot_dimension_numbers<[1], [0], [0], [1], [0, 0, 1, 1], [], []>} : vector<8x200xbf16>, vector<200x128xbf16>, vector<8x128xf32> -> vector<8x128xf32>
    %c0_3 = arith.constant 0 : index
    %c0_4 = arith.constant 0 : index
    %3 = vector.load %arg3[%c0_3, %c0_4] : memref<8x1xf32, #tpu.memory_space<vmem>>, vector<8x1xf32>
    %4 = vector.broadcast %3 : vector<8x1xf32> to vector<8x128xf32>
    %5 = arith.addf %2, %4 : vector<8x128xf32>
    %c0_5 = arith.constant 0 : index
    %c0_6 = arith.constant 0 : index
    %6 = vector.load %arg4[%c0_5, %c0_6] : memref<8x8xbf16, #tpu.memory_space<vmem>>, vector<8x8xbf16>
    %c0_7 = arith.constant 0 : index
    %c0_8 = arith.constant 0 : index
    %7 = vector.load %arg5[%c0_7, %c0_8] : memref<8x1xf32, #tpu.memory_space<vmem>>, vector<8x1xf32>
    %8 = arith.mulf %5, %5 : vector<8x128xf32>
    %9 = arith.truncf %8 : vector<8x128xf32> to vector<8x128xbf16>
    %cst_9 = arith.constant dense<0.000000e+00> : vector<8x128xf32>
    %10 = tpu.matmul %6, %9, %cst_9 {dimension_numbers = #tpu.dot_dimension_numbers<[1], [0], [0], [1], [0, 0, 1, 1], [], []>} : vector<8x8xbf16>, vector<8x128xbf16>, vector<8x128xf32> -> vector<8x128xf32>
    %11 = vector.broadcast %7 : vector<8x1xf32> to vector<8x128xf32>
    %12 = arith.addf %10, %11 : vector<8x128xf32>
    %13 = math.rsqrt %12 : vector<8x128xf32>
    %14 = arith.mulf %5, %13 : vector<8x128xf32>
    %c0_10 = arith.constant 0 : index
    %c0_11 = arith.constant 0 : index
    %15 = vector.load %arg6[%c0_10, %c0_11] : memref<8x128xf32, #tpu.memory_space<vmem>>, vector<8x128xf32>
    tpu.vector_store %arg6[%c0_10, %c0_11], %14 {strides = array<i32>} : memref<8x128xf32, #tpu.memory_space<vmem>>, vector<8x128xf32>,
    return
  }
  func.func @transform_0(%arg0: i32) -> (i32, i32) {
    %c0_i32 = arith.constant 0 : i32
    %c0_i32_0 = arith.constant 0 : i32
    return %c0_i32, %arg0 : i32, i32
  }
  func.func @transform_1(%arg0: i32) -> (i32, i32) {
    %c0_i32 = arith.constant 0 : i32
    %c0_i32_0 = arith.constant 0 : i32
    %c0_i32_1 = arith.constant 0 : i32
    return %c0_i32, %c0_i32_0 : i32, i32
  }
  func.func @transform_2(%arg0: i32) -> (i32, i32) {
    %c0_i32 = arith.constant 0 : i32
    %c0_i32_0 = arith.constant 0 : i32
    %c0_i32_1 = arith.constant 0 : i32
    return %c0_i32, %c0_i32_0 : i32, i32
  }
  func.func @transform_3(%arg0: i32) -> (i32, i32) {
    %c0_i32 = arith.constant 0 : i32
    %c0_i32_0 = arith.constant 0 : i32
    %c0_i32_1 = arith.constant 0 : i32
    return %c0_i32, %c0_i32_0 : i32, i32
  }
  func.func @transform_4(%arg0: i32) -> (i32, i32) {
    %c0_i32 = arith.constant 0 : i32
    %c0_i32_0 = arith.constant 0 : i32
    %c0_i32_1 = arith.constant 0 : i32
    return %c0_i32, %c0_i32_0 : i32, i32
  }
  func.func @transform_5(%arg0: i32) -> (i32, i32) {
    %c0_i32 = arith.constant 0 : i32
    %c0_i32_0 = arith.constant 0 : i32
    return %c0_i32, %arg0 : i32, i32
  }
}

</mosaic_0001>

<bundles_post_ra>
// kernel: tpu_custom_call.1
= control target key start
LH: loop header
LB: loop body
LE: loop exit
PB: predicated region body
PF: predicated region fallthrough
CT: control target
= control target key end

     0   :  { %10 = vsyncpa [#allocation3], 0  ;;  %s420_s0 = inlined_call_operand.hbm [shape: bf16[200,128], index: 0, kind: input, shape index: {}]   ;;  %s421_s1 = inlined_call_operand.vmem [shape: bf16[8,200], index: 1, kind: input, shape index: {}]   ;;  %s422_s2 = inlined_call_operand.vmem [shape: f32[8,1], index: 2, kind: input, shape index: {}]   ;;  %s423_s3 = inlined_call_operand.vmem [shape: bf16[8,8], index: 3, kind: input, shape index: {}]   ;;  %s424_s4 = inlined_call_operand.vmem [shape: f32[8,1], index: 4, kind: input, shape index: {}]   ;;  %s425_s5 = inlined_call_operand.hbm [shape: f32[8,128], index: 5, kind: output, shape index: {}]  }
   0x1   :  { %11 = vsyncpa [#allocation4], 0  ;;  %s16_s20 = sshll.u32 %s420_s0, 4  ;;  %s365_s21 = smov [#allocation2]   ;;  %s17_s20 = int_to_ptr.hbm [resolvable:$true] %s16_s20 }
   0x2   :  { %s18_s22 = sshll.u32 %s365_s21, 4  ;;  %s366_s23 = smov 64   ;;  %s19_s22 = int_to_ptr.vmem [resolvable:$true] %s18_s22 }
   0x3   :  { %s367_s24 = smov 4  }
   0x4   :  { %24 = dma.hbm_to_vmem [thread:$0]  %s17_s20, 1600, %s19_s22, [#allocation3], %s366_s23, %s366_s23, %s367_s24  }
   0x5   :  { %361 = dma.done.wait [#allocation3], 1600  }
   0x6   :  { %362 = vsyncadd [#allocation3], 4294965696  ;;  %v300_v0 = vld [vmem:[#allocation2 + $0x38] sm:$0xff]  ;;  %v63_v1 = vld [vmem:[#allocation2 + $0x60] sm:$0xf]  ;;  %vm155_vm0 = vcmask 1043456  }
   0x7   :  { %v125_v2 = vunpack.c.l.b16 %v63_v1  ;;  %159 = vmatpush.bf16.msra.mxu0 %v300_v0  ;;  %v299_v3 = vld [vmem:[#allocation2 + $0x30] sm:$0xff]  ;;  %v368_v4 = vmov 0   ;;  %v64_v6 = vld [vmem:[%s422_s2] sm:$0xff]  ;;  %v298_v8 = vld [vmem:[#allocation2 + $0x28] sm:$0xff]  ;;  %vm151_vm1 = vcmask 588800   ;;  %vm194_vm2 = vcmask 64512  }
   0x8   :  { %310 = vset.pattern.permute.xlu0 %v368_v4  ;;  %v304_v9 = vld [vmem:[#allocation2 + $0x58] sm:$0xff]  ;;  %v297_v10 = vld [vmem:[#allocation2 + $0x20] sm:$0xff]  ;;  %v303_v11 = vld [vmem:[#allocation2 + $0x50] sm:$0xff]  ;;  %s369_s29 = smov [#allocation5]  }
   0x9   :  { %v138_v5 = vpack.c.b16 %v125_v2, %v125_v2  ;;  %67 = vperm.xlu0 %310, %v64_v6   ;;  %v186_v12 = vld [vmem:[%s424_s4] sm:$0xff]  ;;  %v296_v13 = vld [vmem:[#allocation2 + $0x18] sm:$0xff]  ;;  %v302_v14 = vld [vmem:[#allocation2 + $0x48] sm:$0xff]  ;;  %s231_s30 = sshll.u32 %s369_s29, 4  ;;  %s232_s30 = int_to_ptr.vmem [resolvable:$true] %s231_s30 }
   0xa   :  { %v38_v15 = vld [vmem:[%s421_s1] sm:$0xff]  ;;  %v295_v17 = vld [vmem:[#allocation2 + $0x10] sm:$0xff]  ;;  %v294_v20 = vld [vmem:[#allocation2 + $0x8] sm:$0xff] }
   0xb   :  { %v157_v7 = vsel %vm155_vm0, %v138_v5, 0  ;;  %160 = vmatpush.bf16.msra.mxu0 %v299_v3  ;;  %v72_v16 = vunpack.c.h.b16 %v38_v15  ;;  %v301_v18 = vld [vmem:[#allocation2 + $0x40] sm:$0xff]  ;;  %v71_v21 = vunpack.c.l.b16 %v38_v15 }
   0xc   :  { %175 = vmatpush.bf16.msra.mxu1 %v157_v7  ;;  %v293_v22 = vld [vmem:[#allocation2] sm:$0xff] }
   0xd   :  { %v74_v19 = vpack.c.b16 %v72_v16, %v72_v16  ;;  %v73_v23 = vpack.c.b16 %v71_v21, %v71_v21  ;;  %v185_v34 = vld [vmem:[%s423_s3] sm:$0xf]  ;;  %s233_s3 = sshll.u32 %s425_s5, 4  ;;  %s234_s3 = int_to_ptr.hbm [resolvable:$true] %s233_s3 }
   0xf   :  { %161 = vmatpush.bf16.msra.mxu0 %v298_v8 }
  0x10   :  { %176 = vmatpush.bf16.msra.mxu1 %v304_v9 }
  0x11   :  { %191 = vperm.xlu0 %310, %v186_v12  }
  0x13   :  { %162 = vmatpush.bf16.msra.mxu0 %v297_v10 }
  0x14   :  { %177 = vmatpush.bf16.msra.mxu1 %v303_v11 }
  0x17   :  { %163 = vmatpush.bf16.msra.mxu0 %v296_v13 }
  0x18   :  { %178 = vmatpush.bf16.msra.mxu1 %v302_v14 }
  0x1b   :  { %164 = vmatpush.bf16.msra.mxu0 %v295_v17 }
  0x1c   :  { %179 = vmatpush.bf16.msra.mxu1 %v301_v18 }
  0x1f   :  { %291 = vmatmul.msk.bf16.vlgmr.msra.gmra.mxu1 %vm151_vm1, %v74_v19  ;;  %165 = vmatpush.bf16.msra.mxu0 %v294_v20 }
  0x23   :  { %166 = vmatpush.bf16.msra.mxu0 %v293_v22 }
  0x26   :  { %167 = vmatmul.bf16.vlgmr.msra.gmra.mxu0 %v73_v23 }
  0x7b   :  { %v68_v25 = vpop.permute.xlu0 %67 }
  0x83   :  { %v192_v35 = vpop.permute.xlu0 %191 }
  0x9c   :  { %v181_v24 = vpop.f32.mrf.mxu1 }
  0xa3   :  { %v168_v26 = vpop.f32.mrf.mxu0 }
  0xa4   :  { %v183_v27 = vpop.f32.mrf.mxu1  ;;  %v169_v28 = vadd.f32 %v168_v26, %v68_v25 }
  0xa6   :  { %v182_v29 = vadd.f32 %v181_v24, %v169_v28 }
  0xa8   :  { %v187_v30 = vmul.f32 %v182_v29, %v182_v29 }
  0xaa   :  { %v188_v31 = vpack.c.bf16 %v187_v30, %v187_v30 }
  0xab   :  { %v170_v32 = vpop.f32.mrf.mxu0 }
  0xac   :  { %v199_v33 = vsel %vm155_vm0, %v188_v31, 0 }
  0xad   :  { %208 = vmatpush.bf16.msra.mxu2 %v199_v33 }
  0xb0   :  { %292 = vmatmul.msk.bf16.vlgmr.msra.gmra.mxu2 %vm194_vm2, %v185_v34 }
 0x133   :  { %v210_v36 = vpop.f32.mrf.mxu2 }
 0x134   :  { %v211_v37 = vadd.f32 %v210_v36, %v192_v35 }
 0x136   :  { %311 = vrsqrt.f32 %v211_v37  ;;  %vm220_vm4 = vweird.f32 %v211_v37 }
 0x13b   :  { %v212_v38 = vpop.f32.mrf.mxu2 }
 0x13c   :  { %v312_v39 = vpop.eup %311 }
 0x13d   :  { %v215_v40 = vmul.f32 %v312_v39, %v211_v37  ;;  %vm221_vm3 = vweird.f32 %v312_v39 }
 0x13e   :  { %vm222_vm5 = vmor %vm220_vm4, %vm221_vm3 }
 0x13f   :  { %v216_v41 = vmul.f32 %v312_v39, %v215_v40 }
 0x141   :  { %v217_v42 = vmul.f32 0.5, %v216_v41 }
 0x143   :  { %v218_v43 = vsub.f32 1.5, %v217_v42 }
 0x145   :  { %v219_v44 = vmul.f32 %v312_v39, %v218_v43 }
 0x147   :  { %v223_v45 = vsel %vm222_vm5, %v312_v39, %v219_v44 }
 0x148   :  { %v224_v46 = vmul.f32 %v223_v45, %v182_v29 }
 0x14a   :  { %225 = vst [vmem:[#allocation5] sm:$0xff] %v224_v46 }
 0x14b   :  { %236 = dma.vmem_to_hbm [thread:$0]  %s232_s30, 128, %s234_s3, [#allocation4]  }
 0x14c   :  { %363 = dma.done.wait [#allocation4], 128  }
 0x14d   :  { %364 = vsyncadd [#allocation4], 4294967168 }
 0x14e   :  { %241 = vsyncpa [#allocation3], 1 }
 0x14f   :  { %242 = vsyncpa [#allocation4], 1 }

</bundles_post_ra>
